<compile_context>
chip_gen: v7x
topology: tpu7x:2x2x1
jax: 0.10.0
libtpu: 0.0.40
codegen_flags: <defaults>
</compile_context>

<pallas_src>
import functools

import jax
import jax.numpy as jnp
from jax.experimental import pallas as pl
from jax.experimental.pallas import tpu as pltpu

_LANE = 128
_MIN_ROWS = 16  # >= bf16 min sublane tile (16, 128); also fine for f32 (8, 128)


def _round_up(x, m):
    return (x + m - 1) // m * m


def _vmem_capacity_bytes():
    """Per-core VMEM capacity (128 MiB on v5e/v6e, 64 MiB on v7x)."""
    try:
        info = pltpu.get_tpu_info()
        cap = getattr(info, "vmem_capacity_bytes", None)
        if cap:
            return int(cap)
    except Exception:
        pass
    return 64 * 1024 * 1024  # conservative fallback (v7x per-TC VMEM)


def _working_set_bytes(tb, tile_h, n_feature, o_pad, x_bytes, compute_bytes, out_bytes):
    """VMEM working set for one grid step, incl. Pallas default double-buffering."""
    x_tile = 2 * tb * n_feature * x_bytes          # streamed activation tile
    w1_chunk = 2 * n_feature * tile_h * compute_bytes
    b1_chunk = 2 * tile_h * 4
    w2_chunk = 2 * tile_h * o_pad * compute_bytes
    b2_tile = 2 * o_pad * 4
    out_tile = 2 * tb * o_pad * out_bytes
    acc = tb * o_pad * 4                            # scratch accumulator (1 copy)
    hidden = tb * tile_h * 4                        # in-kernel f32 hidden chunk
    return x_tile + w1_chunk + b1_chunk + w2_chunk + b2_tile + out_tile + acc + hidden


def _choose_tile_b(B, tile_h, n_feature, o_pad, x_bytes, compute_bytes, out_bytes, budget):
    b_cap = max(_round_up(B, _MIN_ROWS), _MIN_ROWS)
    tile_b = _MIN_ROWS
    for tb in (2048, 1024, 512, 256, 128, 64, 32, 16):
        if tb > b_cap:
            continue
        if _working_set_bytes(tb, tile_h, n_feature, o_pad,
                              x_bytes, compute_bytes, out_bytes) <= budget:
            tile_b = tb
            break
    # v7x: prefer >=2 batch programs so the "parallel" axis can split across the
    # 2 TensorCores and each still pipelines; harmless (serial loop) on v5e/v6e.
    if B > _MIN_ROWS and pl.cdiv(B, tile_b) < 2:
        tile_b = max(_MIN_ROWS, min(tile_b, _round_up(pl.cdiv(B, 2), _MIN_ROWS)))
    return tile_b


def _mlp_kernel(x_ref, w1_ref, b1_ref, w2_ref, b2_ref, o_ref, acc_ref, *, compute_dtype):
    j = pl.program_id(1)  # hidden-chunk (reduction) axis, last in grid

    @pl.when(j == 0)
    def _init():
        acc_ref[...] = jnp.zeros_like(acc_ref)

    # In-kernel cast of the streamed activation tile (no wrapper copy of x).
    x = x_ref[...].astype(compute_dtype)
    # hidden chunk = relu(x @ W1[:, chunk] + b1[chunk]); MXU matmul, f32 acc,
    # bias add + ReLU in f32 on the VPU.
    h = jnp.dot(x, w1_ref[...], preferred_element_type=jnp.float32)
    h = jnp.maximum(h + b1_ref[...], 0.0)                      # (TB, TH) + (1, TH)
    # Accumulate this chunk's contribution to the output in f32 VMEM scratch.
    acc_ref[...] += jnp.dot(h.astype(compute_dtype), w2_ref[...],
                            preferred_element_type=jnp.float32)

    @pl.when(j == pl.num_programs(1) - 1)
    def _finalize():
        # Lane-dense (o_pad = k*128) unmasked store.
        o_ref[...] = (acc_ref[...] + b2_ref[...]).astype(o_ref.dtype)


def net_forward(x, w1, b1, w2, b2, *, compute_dtype=jnp.bfloat16, tile_h=None):
    """Pallas TPU forward of Net.

    x:  (B, n_feature); w1: (n_feature, n_hidden); b1: (n_hidden,) or (1, n_hidden)
    w2: (n_hidden, n_output); b2: (n_output,) or (1, n_output)
    Weights stored as (in, out) so the kernel computes y = x @ W + b directly.
    """
    out_dtype = x.dtype
    B, n_feature = x.shape
    n_hidden = w1.shape[1]
    n_output = w2.shape[1]

    h_pad = _round_up(n_hidden, _LANE)
    o_pad = _round_up(n_output, _LANE)   # lane-dense output -> unmasked vst

    if tile_h is None:
        tile_h = h_pad
        if h_pad > 512:
            for cand in (512, 384, 256, 128):
                if h_pad % cand == 0:
                    tile_h = cand
                    break
    assert tile_h % _LANE == 0 and h_pad % tile_h == 0
    num_h = h_pad // tile_h

    compute_bytes = jnp.dtype(compute_dtype).itemsize
    x_bytes = jnp.dtype(x.dtype).itemsize
    out_bytes = jnp.dtype(out_dtype).itemsize

    vmem_cap = _vmem_capacity_bytes()
    vmem_budget = int(vmem_cap * 0.75)          # ~25% headroom per generation
    tile_b = _choose_tile_b(B, tile_h, n_feature, o_pad,
                            x_bytes, compute_bytes, out_bytes, vmem_budget)

    # One-time, tiny padded/cast weight & bias copies.  Padding is exact:
    # padded hidden columns get b1=0 -> relu(0)=0 -> multiplied by zero W2 rows.
    w1p = jnp.zeros((n_feature, h_pad), compute_dtype).at[:, :n_hidden].set(
        w1.astype(compute_dtype))
    b1p = jnp.zeros((1, h_pad), jnp.float32).at[:, :n_hidden].set(
        b1.reshape(1, n_hidden).astype(jnp.float32))
    w2p = jnp.zeros((h_pad, o_pad), compute_dtype).at[:n_hidden, :n_output].set(
        w2.astype(compute_dtype))
    b2p = jnp.zeros((1, o_pad), jnp.float32).at[:, :n_output].set(
        b2.reshape(1, n_output).astype(jnp.float32))

    grid = (pl.cdiv(B, tile_b), num_h)   # batch parallel, hidden reduction last

    out = pl.pallas_call(
        functools.partial(_mlp_kernel, compute_dtype=compute_dtype),
        out_shape=jax.ShapeDtypeStruct((B, o_pad), out_dtype),
        grid_spec=pltpu.PrefetchScalarGridSpec(
            num_scalar_prefetch=0,
            grid=grid,
            in_specs=[
                # x streamed per batch tile; last dim == full array dim (legal).
                pl.BlockSpec((tile_b, n_feature), lambda i, j: (i, 0)),
                # Weight / bias chunks streamed over the hidden axis.
                pl.BlockSpec((n_feature, tile_h), lambda i, j: (0, j)),
                pl.BlockSpec((1, tile_h), lambda i, j: (0, j)),
                pl.BlockSpec((tile_h, o_pad), lambda i, j: (j, 0)),
                pl.BlockSpec((1, o_pad), lambda i, j: (0, 0)),
            ],
            out_specs=pl.BlockSpec((tile_b, o_pad), lambda i, j: (i, 0)),
            scratch_shapes=[pltpu.VMEM((tile_b, o_pad), jnp.float32)],
        ),
        compiler_params=pltpu.CompilerParams(
            dimension_semantics=("parallel", "arbitrary"),
            vmem_limit_bytes=int(vmem_cap * 0.85),
        ),
    )(x, w1p, b1p, w2p, b2p)

    # Strip output-lane padding (batch is never padded).
    return out[:, :n_output]


def init_params(key, n_feature, n_hidden, n_output, dtype=jnp.float32):
    """Deterministic init mimicking torch.nn.Linear default U(-1/sqrt(fan_in), +)."""
    k1, k2, k3, k4 = jax.random.split(key, 4)
    bound1 = 1.0 / jnp.sqrt(jnp.array(n_feature, dtype))
    bound2 = 1.0 / jnp.sqrt(jnp.array(n_hidden, dtype))
    w1 = jax.random.uniform(k1, (n_feature, n_hidden), dtype, -bound1, bound1)
    b1 = jax.random.uniform(k2, (1, n_hidden), dtype, -bound1, bound1)
    w2 = jax.random.uniform(k3, (n_hidden, n_output), dtype, -bound2, bound2)
    b2 = jax.random.uniform(k4, (1, n_output), dtype, -bound2, bound2)
    return w1, b1, w2, b2


def net_forward_ref(x, w1, b1, w2, b2):
    hp = jax.lax.Precision.HIGHEST
    h = jnp.maximum(jnp.dot(x, w1, precision=hp) + b1.reshape(1, -1), 0.0)
    return jnp.dot(h, w2, precision=hp) + b2.reshape(1, -1)


def net_forward_bf16_ref(x, w1, b1, w2, b2):
    bf = jnp.bfloat16
    h = jnp.dot(x.astype(bf), w1.astype(bf), preferred_element_type=jnp.float32)
    h = jnp.maximum(h + b1.reshape(1, -1).astype(jnp.float32), 0.0)
    y = jnp.dot(h.astype(bf), w2.astype(bf), preferred_element_type=jnp.float32)
    return y + b2.reshape(1, -1).astype(jnp.float32)


if __name__ == "__main__":
    key = jax.random.PRNGKey(0)
    n_feature, n_hidden, n_output = 16, 32, 4
    kx, kp, kx2, kp3, kx3 = jax.random.split(key, 5)
    w1, b1, w2, b2 = init_params(kp, n_feature, n_hidden, n_output)

    # --- f32 compute path, exact batch tile --------------------------------
    batch = 16
    x = jax.random.normal(kx, (batch, n_feature), jnp.float32)
    out = jax.block_until_ready(
        net_forward(x, w1, b1, w2, b2, compute_dtype=jnp.float32))
    ref = net_forward_ref(x, w1, b1, w2, b2)
    assert out.shape == (batch, n_output)
    assert jnp.allclose(out, ref, atol=1e-4, rtol=1e-4), "f32 mismatch vs reference"

    # --- bf16 MXU path, ragged batch (2 batch programs, masked last block) --
    batch2 = 100
    x2 = jax.random.normal(kx2, (batch2, n_feature), jnp.float32)
    out2 = jax.block_until_ready(
        net_forward(x2, w1, b1, w2, b2, compute_dtype=jnp.bfloat16))
    ref2 = net_forward_bf16_ref(x2, w1, b1, w2, b2)
    assert out2.shape == (batch2, n_output)
    assert jnp.allclose(out2, ref2, atol=2e-2, rtol=2e-2), "bf16 mismatch vs reference"

    # --- f32 path exercising the hidden-dim chunked accumulator (3 chunks) --
    n_hidden3 = 320
    w1c, b1c, w2c, b2c = init_params(kp3, n_feature, n_hidden3, n_output)
    x3 = jax.random.normal(kx3, (24, n_feature), jnp.float32)
    out3 = jax.block_until_ready(
        net_forward(x3, w1c, b1c, w2c, b2c, compute_dtype=jnp.float32, tile_h=128))
    ref3 = net_forward_ref(x3, w1c, b1c, w2c, b2c)
    assert out3.shape == (24, n_output)
    assert jnp.allclose(out3, ref3, atol=1e-3, rtol=1e-3), "chunked mismatch vs reference"

    print("KERNEL_OK")
</pallas_src>

<mosaic_0001>
module attributes {stable_mosaic.version = 11 : i64} {
  func.func @_mlp_kernel(%arg0: i32, %arg1: i32, %arg2: memref<16x16xf32, #tpu.memory_space<vmem>>, %arg3: memref<16x128xf32, #tpu.memory_space<vmem>>, %arg4: memref<1x128xf32, #tpu.memory_space<vmem>>, %arg5: memref<128x128xf32, #tpu.memory_space<vmem>>, %arg6: memref<1x128xf32, #tpu.memory_space<vmem>>, %arg7: memref<16x128xf32, #tpu.memory_space<vmem>>, %arg8: memref<16x128xf32, #tpu.memory_space<vmem>>) attributes {dimension_semantics = [#tpu.dimension_semantics<parallel>, #tpu.dimension_semantics<arbitrary>], iteration_bounds = array<i64: 1, 1>, scalar_prefetch = 0 : i64, scratch_operands = 1 : i64, tpu.core_type = #tpu.core_type<tc>, window_params = [{transform_indices = @transform_0, window_bounds = array<i64: 16, 16>}, {transform_indices = @transform_1, window_bounds = array<i64: 16, 128>}, {transform_indices = @transform_2, window_bounds = array<i64: 1, 128>}, {transform_indices = @transform_3, window_bounds = array<i64: 128, 128>}, {pipeline_mode = #tpu.pipeline_mode<synchronous>, transform_indices = @transform_4, window_bounds = array<i64: 1, 128>}, {transform_indices = @transform_5, window_bounds = array<i64: 16, 128>}]} {
    %c0_i32 = arith.constant 0 : i32
    %0 = arith.cmpi eq, %arg1, %c0_i32 : i32
    %1 = arith.extui %0 : i1 to i32
    %c0_i32_0 = arith.constant 0 : i32
    %2 = arith.cmpi ne, %1, %c0_i32_0 : i32
    scf.if %2 {
      %cst_16 = arith.constant 0.000000e+00 : f32
      %19 = vector.broadcast %cst_16 : f32 to vector<16x128xf32>
      %c0_17 = arith.constant 0 : index
      %c0_18 = arith.constant 0 : index
      %20 = vector.load %arg8[%c0_17, %c0_18] : memref<16x128xf32, #tpu.memory_space<vmem>>, vector<16x128xf32>
      tpu.vector_store %arg8[%c0_17, %c0_18], %19 {strides = array<i32>} : memref<16x128xf32, #tpu.memory_space<vmem>>, vector<16x128xf32>,
    } else {
    }
    %c0 = arith.constant 0 : index
    %c0_1 = arith.constant 0 : index
    %3 = vector.load %arg2[%c0, %c0_1] : memref<16x16xf32, #tpu.memory_space<vmem>>, vector<16x16xf32>
    %c0_2 = arith.constant 0 : index
    %c0_3 = arith.constant 0 : index
    %4 = vector.load %arg3[%c0_2, %c0_3] : memref<16x128xf32, #tpu.memory_space<vmem>>, vector<16x128xf32>
    %cst = arith.constant dense<0.000000e+00> : vector<16x128xf32>
    %5 = tpu.matmul %3, %4, %cst {dimension_numbers = #tpu.dot_dimension_numbers<[1], [0], [0], [1], [0, 0, 1, 1], [], []>} : vector<16x16xf32>, vector<16x128xf32>, vector<16x128xf32> -> vector<16x128xf32>
    %c0_4 = arith.constant 0 : index
    %c0_5 = arith.constant 0 : index
    %6 = vector.load %arg4[%c0_4, %c0_5] : memref<1x128xf32, #tpu.memory_space<vmem>>, vector<1x128xf32>
    %7 = vector.broadcast %6 : vector<1x128xf32> to vector<16x128xf32>
    %8 = arith.addf %5, %7 : vector<16x128xf32>
    %cst_6 = arith.constant 0.000000e+00 : f32
    %9 = vector.broadcast %cst_6 : f32 to vector<16x128xf32>
    %10 = arith.maximumf %8, %9 : vector<16x128xf32>
    %c0_7 = arith.constant 0 : index
    %c0_8 = arith.constant 0 : index
    %11 = vector.load %arg8[%c0_7, %c0_8] : memref<16x128xf32, #tpu.memory_space<vmem>>, vector<16x128xf32>
    %c0_9 = arith.constant 0 : index
    %c0_10 = arith.constant 0 : index
    %12 = vector.load %arg5[%c0_9, %c0_10] : memref<128x128xf32, #tpu.memory_space<vmem>>, vector<128x128xf32>
    %cst_11 = arith.constant dense<0.000000e+00> : vector<16x128xf32>
    %13 = tpu.matmul %10, %12, %cst_11 {dimension_numbers = #tpu.dot_dimension_numbers<[1], [0], [0], [1], [0, 0, 1, 1], [], []>} : vector<16x128xf32>, vector<128x128xf32>, vector<16x128xf32> -> vector<16x128xf32>
    %14 = arith.addf %11, %13 : vector<16x128xf32>
    %c0_12 = arith.constant 0 : index
    %c0_13 = arith.constant 0 : index
    %15 = vector.load %arg8[%c0_12, %c0_13] : memref<16x128xf32, #tpu.memory_space<vmem>>, vector<16x128xf32>
    tpu.vector_store %arg8[%c0_12, %c0_13], %14 {strides = array<i32>} : memref<16x128xf32, #tpu.memory_space<vmem>>, vector<16x128xf32>,
    %c0_i32_14 = arith.constant 0 : i32
    %16 = arith.cmpi eq, %arg1, %c0_i32_14 : i32
    %17 = arith.extui %16 : i1 to i32
    %c0_i32_15 = arith.constant 0 : i32
    %18 = arith.cmpi ne, %17, %c0_i32_15 : i32
    scf.if %18 {
      %c0_16 = arith.constant 0 : index
      %c0_17 = arith.constant 0 : index
      %19 = vector.load %arg8[%c0_16, %c0_17] : memref<16x128xf32, #tpu.memory_space<vmem>>, vector<16x128xf32>
      %c0_18 = arith.constant 0 : index
      %c0_19 = arith.constant 0 : index
      %20 = vector.load %arg6[%c0_18, %c0_19] : memref<1x128xf32, #tpu.memory_space<vmem>>, vector<1x128xf32>
      %21 = vector.broadcast %20 : vector<1x128xf32> to vector<16x128xf32>
      %22 = arith.addf %19, %21 : vector<16x128xf32>
      %c0_20 = arith.constant 0 : index
      %c0_21 = arith.constant 0 : index
      %23 = vector.load %arg7[%c0_20, %c0_21] : memref<16x128xf32, #tpu.memory_space<vmem>>, vector<16x128xf32>
      tpu.vector_store %arg7[%c0_20, %c0_21], %22 {strides = array<i32>} : memref<16x128xf32, #tpu.memory_space<vmem>>, vector<16x128xf32>,
    } else {
    }
    return
  }
  func.func @transform_0(%arg0: i32, %arg1: i32) -> (i32, i32) {
    %c0_i32 = arith.constant 0 : i32
    %c0_i32_0 = arith.constant 0 : i32
    return %arg0, %c0_i32 : i32, i32
  }
  func.func @transform_1(%arg0: i32, %arg1: i32) -> (i32, i32) {
    %c0_i32 = arith.constant 0 : i32
    %c0_i32_0 = arith.constant 0 : i32
    return %c0_i32, %arg1 : i32, i32
  }
  func.func @transform_2(%arg0: i32, %arg1: i32) -> (i32, i32) {
    %c0_i32 = arith.constant 0 : i32
    %c0_i32_0 = arith.constant 0 : i32
    return %c0_i32, %arg1 : i32, i32
  }
  func.func @transform_3(%arg0: i32, %arg1: i32) -> (i32, i32) {
    %c0_i32 = arith.constant 0 : i32
    %c0_i32_0 = arith.constant 0 : i32
    return %arg1, %c0_i32 : i32, i32
  }
  func.func @transform_4(%arg0: i32, %arg1: i32) -> (i32, i32) {
    %c0_i32 = arith.constant 0 : i32
    %c0_i32_0 = arith.constant 0 : i32
    %c0_i32_1 = arith.constant 0 : i32
    return %c0_i32, %c0_i32_0 : i32, i32
  }
  func.func @transform_5(%arg0: i32, %arg1: i32) -> (i32, i32) {
    %c0_i32 = arith.constant 0 : i32
    %c0_i32_0 = arith.constant 0 : i32
    return %arg0, %c0_i32 : i32, i32
  }
}

</mosaic_0001>

<bundles_post_ra>
// kernel: tpu_custom_call.1
= control target key start
LH: loop header
LB: loop body
LE: loop exit
PB: predicated region body
PF: predicated region fallthrough
CT: control target
= control target key end

     0   :  { %10 = vsyncpa [#allocation4], 0  ;;  %s609_s0 = inlined_call_operand.hbm [shape: f32[16,16], index: 0, kind: input, shape index: {}]   ;;  %s610_s1 = inlined_call_operand.hbm [shape: f32[16,128], index: 1, kind: input, shape index: {}]   ;;  %s611_s2 = inlined_call_operand.vmem [shape: f32[1,128], index: 2, kind: input, shape index: {}]   ;;  %s612_s3 = inlined_call_operand.hbm [shape: f32[128,128], index: 3, kind: input, shape index: {}]   ;;  %s613_s4 = inlined_call_operand.vmem [shape: f32[1,128], index: 4, kind: input, shape index: {}]   ;;  %s614_s5 = inlined_call_operand.hbm [shape: f32[16,128], index: 5, kind: output, shape index: {}]  }
   0x1   :  { %11 = vsyncpa [#allocation7], 0 }
   0x2   :  { %12 = vsyncpa [#allocation5], 0  ;;  %s498_s18 = smov [#allocation6]   ;;  %s499_s20 = smov [#allocation3]  }
   0x3   :  { %s30_s19 = sshll.u32 %s498_s18, 4  ;;  %s18_s21 = sshll.u32 %s499_s20, 4  ;;  %s31_s19 = int_to_ptr.vmem [resolvable:$true] %s30_s19  ;;  %s534_s21 = int_to_ptr.vmem [resolvable:$true] %s18_s21 }
   0x4   :  { %s404_s24 = scalar_lea.hbm %s610_s1, 256 }
   0x5   :  { %p405_p0 = scmp.ne.s32.totalorder %s610_s1, %s404_s24  ;;  %p408_p1 = scmp.lt.u32.totalorder %s404_s24, %s610_s1 }
   0x7   :  { %p410_p2 = pnand %p408_p1, %p405_p0 }
   0x9   :  { %413 = shalt.err (!%p410_p2)
}
   0xa   :  { %s414_s29 = scalar_lea.vmem %s31_s19, 256  ;;  %p419_p4 = scmp.lt.s32.totalorder %s31_s19, %s31_s19 }
   0xb   :  { %p415_p3 = scmp.ne.s32.totalorder %s31_s19, %s414_s29  ;;  %p420_p5 = scmp.lt.s32.totalorder %s414_s29, %s414_s29 }
   0xd   :  { %p421_p6 = por %p420_p5, %p419_p4 }
   0xf   :  { %p422_p7 = pnand %p421_p6, %p415_p3 }
  0x11   :  { %425 = shalt.err (!%p422_p7)
}
  0x12   :  { %s500_s30 = smov 128   ;;  %s501_s6 = smov 8  }
  0x13   :  { %36 = dma.hbm_to_vmem [thread:$0]  %s610_s1, 256, %s31_s19, [#allocation7], %s500_s30, %s500_s30, %s501_s6  }
  0x14   :  { %s426_s11 = scalar_lea.hbm %s609_s0, 256 }
  0x15   :  { %p427_p8 = scmp.ne.s32.totalorder %s609_s0, %s426_s11  ;;  %p430_p9 = scmp.lt.u32.totalorder %s426_s11, %s609_s0 }
  0x17   :  { %p432_p10 = pnand %p430_p9, %p427_p8 }
  0x19   :  { %435 = shalt.err (!%p432_p10)
}
  0x1a   :  { %s436_s16 = scalar_lea.vmem %s534_s21, 256  ;;  %p441_p12 = scmp.lt.s32.totalorder %s534_s21, %s534_s21 }
  0x1b   :  { %p437_p11 = scmp.ne.s32.totalorder %s534_s21, %s436_s16  ;;  %p442_p13 = scmp.lt.s32.totalorder %s436_s16, %s436_s16 }
  0x1d   :  { %p443_p0 = por %p442_p13, %p441_p12 }
  0x1f   :  { %p444_p1 = pnand %p443_p0, %p437_p11 }
  0x21   :  { %447 = shalt.err (!%p444_p1)
}
  0x22   :  { %24 = dma.hbm_to_vmem [thread:$0]  %s609_s0, 256, %s534_s21, [#allocation4], %s500_s30, %s500_s30, %s501_s6  }
  0x23   :  { %s502_s18 = smov [#allocation8]   ;;  %s448_s23 = scalar_lea.hbm %s612_s3, 2048 }
  0x24   :  { %s44_s19 = sshll.u32 %s502_s18, 4  ;;  %p449_p2 = scmp.ne.s32.totalorder %s612_s3, %s448_s23  ;;  %s45_s19 = int_to_ptr.vmem [resolvable:$true] %s44_s19 }
  0x25   :  { %p452_p3 = scmp.lt.u32.totalorder %s448_s23, %s612_s3 }
  0x27   :  { %p454_p4 = pnand %p452_p3, %p449_p2 }
  0x29   :  { %457 = shalt.err (!%p454_p4)
}
  0x2a   :  { %s458_s28 = scalar_lea.vmem %s45_s19, 2048  ;;  %p463_p6 = scmp.lt.s32.totalorder %s45_s19, %s45_s19 }
  0x2b   :  { %p459_p5 = scmp.ne.s32.totalorder %s45_s19, %s458_s28  ;;  %p464_p7 = scmp.lt.s32.totalorder %s458_s28, %s458_s28 }
  0x2d   :  { %p465_p8 = por %p464_p7, %p463_p6 }
  0x2f   :  { %p466_p9 = pnand %p465_p8, %p459_p5 }
  0x31   :  { %469 = shalt.err (!%p466_p9)
}
  0x32   :  { %50 = dma.hbm_to_vmem [thread:$0]  %s612_s3, 2048, %s45_s19, [#allocation7], %s500_s30, %s500_s30, %s501_s6  }
  0x33   :  { %492 = dma.done.wait [#allocation4], 256  }
  0x34   :  { %493 = vsyncadd [#allocation4], 4294967040 }
  0x35   :  { %494 = dma.done.wait [#allocation7], 2304  }
  0x36   :  { %495 = vsyncadd [#allocation7], 4294964992  ;;  %vm79_vm0 = vcmask 130048   ;;  %v70_v0 = vld [vmem:[#allocation6] sm:$0xff]  ;;  %v71_v1 = vld [vmem:[#allocation6 + $0x8] sm:$0xff]  ;;  %s503_s9 = smov [#allocation9]  }
  0x37   :  { %v68_v2 = vld [vmem:[#allocation3] sm:$0xff]  ;;  %v362_v3 = vpack.c.bf16 %v71_v1, %v70_v0  ;;  %v166_v5 = vld [vmem:[#allocation8 + $0x8] sm:$0xff]  ;;  %v167_v7 = vld [vmem:[#allocation8 + $0x10] sm:$0xff]  ;;  %s281_s10 = sshll.u32 %s503_s9, 4  ;;  %s282_s10 = int_to_ptr.vmem [resolvable:$true] %s281_s10 }
  0x38   :  { %324 = vmatprep.mubr.msk.f32.mxu0 %vm79_vm0, %v68_v2  ;;  %v165_v4 = vld [vmem:[#allocation8] sm:$0xff]  ;;  %v168_v8 = vld [vmem:[#allocation8 + $0x18] sm:$0xff]  ;;  %v170_v11 = vld [vmem:[#allocation8 + $0x28] sm:$0xff]  ;;  %p475_p11 = scmp.lt.s32.totalorder %s282_s10, %s282_s10 }
  0x39   :  { %v366_v6 = vpack.c.bf16 %v166_v5, %v165_v4  ;;  %363 = vmatprep.subr.bf16.mxu0 %v362_v3  ;;  %v370_v9 = vpack.c.bf16 %v168_v8, %v167_v7  ;;  %v169_v10 = vld [vmem:[#allocation8 + $0x20] sm:$0xff]  ;;  %v69_v12 = vld [vmem:[#allocation3 + $0x8] sm:$0xff]  ;;  %v171_v14 = vld [vmem:[#allocation8 + $0x30] sm:$0xff] }
  0x3a   :  { %365 = vmatpush3.bf16.msra.mxu0 %v362_v3  ;;  %v374_v13 = vpack.c.bf16 %v170_v11, %v169_v10  ;;  %v172_v15 = vld [vmem:[#allocation8 + $0x38] sm:$0xff]  ;;  %v173_v17 = vld [vmem:[#allocation8 + $0x40] sm:$0xff]  ;;  %v174_v18 = vld [vmem:[#allocation8 + $0x48] sm:$0xff] }
  0x3b   :  { %367 = vmatprep.subr.bf16.mxu1 %v366_v6  ;;  %v378_v16 = vpack.c.bf16 %v172_v15, %v171_v14  ;;  %v382_v19 = vpack.c.bf16 %v174_v18, %v173_v17  ;;  %v175_v20 = vld [vmem:[#allocation8 + $0x50] sm:$0xff]  ;;  %v176_v21 = vld [vmem:[#allocation8 + $0x58] sm:$0xff]  ;;  %v177_v23 = vld [vmem:[#allocation8 + $0x60] sm:$0xff] }
  0x3c   :  { %369 = vmatpush3.bf16.msra.mxu1 %v366_v6  ;;  %v386_v22 = vpack.c.bf16 %v176_v21, %v175_v20  ;;  %v178_v24 = vld [vmem:[#allocation8 + $0x68] sm:$0xff]  ;;  %v179_v26 = vld [vmem:[#allocation8 + $0x70] sm:$0xff]  ;;  %v180_v27 = vld [vmem:[#allocation8 + $0x78] sm:$0xff] }
  0x3d   :  { %371 = vmatprep.subr.bf16.mxu1 %v370_v9  ;;  %325 = vmatmul.mubr.msk.f32.vlgmr.msra.gmra.mrb[0].mxu0 %vm79_vm0, %v69_v12  ;;  %v390_v25 = vpack.c.bf16 %v178_v24, %v177_v23  ;;  %v394_v28 = vpack.c.bf16 %v180_v27, %v179_v26  ;;  %v294_v29 = vld [vmem:[%s611_s2] ss:$0 sm:$0xff]  ;;  %s470_s2 = scalar_lea.vmem %s282_s10, 256 }
  0x3e   :  { %v297_v36 = vld [vmem:[%s613_s4] ss:$0 sm:$0xff]  ;;  %p471_p10 = scmp.ne.s32.totalorder %s282_s10, %s470_s2  ;;  %p476_p12 = scmp.lt.s32.totalorder %s470_s2, %s470_s2 }
  0x40   :  { %373 = vmatpush3.bf16.msra.mxu1 %v370_v9  ;;  %p477_p13 = por %p476_p12, %p475_p11 }
  0x41   :  { %375 = vmatprep.subr.bf16.mxu1 %v374_v13 }
  0x42   :  { %p478_p0 = pnand %p477_p13, %p471_p10 }
  0x44   :  { %377 = vmatpush3.bf16.msra.mxu1 %v374_v13 }
  0x45   :  { %379 = vmatprep.subr.bf16.mxu1 %v378_v16 }
  0x48   :  { %381 = vmatpush3.bf16.msra.mxu1 %v378_v16 }
  0x49   :  { %383 = vmatprep.subr.bf16.mxu1 %v382_v19 }
  0x4c   :  { %385 = vmatpush3.bf16.msra.mxu1 %v382_v19 }
  0x4d   :  { %387 = vmatprep.subr.bf16.mxu1 %v386_v22 }
  0x50   :  { %389 = vmatpush3.bf16.msra.mxu1 %v386_v22 }
  0x51   :  { %391 = vmatprep.subr.bf16.mxu1 %v390_v25 }
  0x54   :  { %393 = vmatpush3.bf16.msra.mxu1 %v390_v25 }
  0x55   :  { %395 = vmatprep.subr.bf16.mxu1 %v394_v28 }
  0x58   :  { %397 = vmatpush3.bf16.msra.mxu1 %v394_v28 }
 0x110   :  { %v326_v30 = vpop.f32.mrb[0].mxu0 }
 0x111   :  { %v158_v31 = vadd.f32 %v326_v30, %v294_v29  ;;  %v152_v32 = vpop.f32.mrb[1].mxu0 }
 0x112   :  { %v153_v33 = vadd.f32 %v294_v29, %v152_v32 }
 0x113   :  { %v162_v35 = vmax.f32 %v158_v31, 0.0 }
 0x114   :  { %v161_v34 = vmax.f32 %v153_v33, 0.0 }
 0x116   :  { %359 = vmatprep.mubr.f32.mxu1 %v161_v34 }
 0x117   :  { %360 = vmatmul.mubr.f32.vlgmr.msra.gmra.mrb[0].mxu1 %v162_v35 }
 0x1ea   :  { %v361_v37 = vpop.f32.mrb[0].mxu1 }
 0x1eb   :  { %v273_v38 = vadd.f32 %v361_v37, %v297_v36  ;;  %v247_v39 = vpop.f32.mrb[1].mxu1 }
 0x1ec   :  { %v272_v40 = vadd.f32 %v297_v36, %v247_v39 }
 0x1ed   :  { %275 = vst [vmem:[#allocation9 + $0x8] sm:$0xff] %v273_v38 }
 0x1ee   :  { %274 = vst [vmem:[#allocation9] sm:$0xff] %v272_v40 }
 0x1ef   :  { %481 = shalt.err (!%p478_p0)
}
 0x1f0   :  { %s482_s4 = scalar_lea.hbm %s614_s5, 256 }
 0x1f1   :  { %p483_p1 = scmp.ne.s32.totalorder %s614_s5, %s482_s4  ;;  %p486_p2 = scmp.lt.u32.totalorder %s482_s4, %s614_s5 }
 0x1f3   :  { %p488_p3 = pnand %p486_p2, %p483_p1 }
 0x1f5   :  { %491 = shalt.err (!%p488_p3)
}
 0x1f6   :  { %287 = dma.vmem_to_hbm [thread:$0]  %s282_s10, 256, %s614_s5, [#allocation5], %s500_s30, %s500_s30, %s501_s6  }
 0x1f7   :  { %496 = dma.done.wait [#allocation5], 256  }
 0x1f8   :  { %497 = vsyncadd [#allocation5], 4294967040 }
 0x1f9   :  { %291 = vsyncpa [#allocation4], 1 }
 0x1fa   :  { %292 = vsyncpa [#allocation7], 1 }
 0x1fb   :  { %293 = vsyncpa [#allocation5], 1 }

</bundles_post_ra>
